<compile_context>
chip_gen: v7x
topology: tpu7x:2x2x1
jax: 0.10.0
libtpu: 0.0.40
codegen_flags: <defaults>
</compile_context>

<pallas_src>
import math
import functools

import jax
import jax.numpy as jnp
from jax import lax
from jax.experimental import pallas as pl
from jax.experimental.pallas import tpu as pltpu


# ----------------------------------------------------------------------------
# Kernel
# ----------------------------------------------------------------------------
def _arcface_kernel(x_ref, wt_ref, invw_ref, label_ref, out_ref, *,
                    s, cos_m, sin_m, th, mm):
    # x_ref:     (B, E)   pre-normalized input rows, matmul_dtype (reused each step)
    # wt_ref:    (E, TC)  raw (un-normalized) transposed weight tile, matmul_dtype
    # invw_ref:  (1, TC)  f32, 1 / max(||w_class||, 1e-12)  (from the f32 weight)
    # label_ref: (B, 1)   int32 labels (reused each step)
    # out_ref:   (B, TC)  f32 logits tile
    raw = jnp.dot(x_ref[...], wt_ref[...], preferred_element_type=jnp.float32)
    # Post-matmul column scaling: B*TC multiplies instead of TC*E, and the
    # scaling happens after f32 accumulation (numerically at least as good).
    cosine = raw * invw_ref[...]

    # Elementwise margin math in f32 (v5e has no bf16 VPU/EUP).
    sine = jnp.sqrt(jnp.clip(1.0 - cosine * cosine, 0.0, 1.0))
    phi = cosine * cos_m - sine * sin_m
    phi = jnp.where(cosine > th, phi, cosine - mm)

    # Scatter phi into the label column of each row.
    tc = out_ref.shape[1]
    cols = pl.program_id(0) * tc + lax.broadcasted_iota(jnp.int32, cosine.shape, 1)
    is_label = cols == label_ref[...]          # (B, TC) vs (B, 1)
    out_ref[...] = jnp.where(is_label, phi, cosine) * s


# ----------------------------------------------------------------------------
# Hardware-aware sizing helpers
# ----------------------------------------------------------------------------
def _physical_vmem_bytes():
    """Physical VMEM per TensorCore; conservative 64 MiB (v7x) fallback."""
    try:
        info = pltpu.get_tpu_info()
        v = getattr(info, "vmem_capacity_bytes", None)
        if v:
            return int(v)
    except Exception:
        pass
    return 64 * 1024 * 1024


def _looks_like_v7x():
    try:
        return "7" in jax.devices()[0].device_kind.lower()
    except Exception:
        return False


def _vmem_limit_bytes(phys, n_wbuf, class_tile, E, B, itemsize):
    """Explicit scoped-VMEM limit from the actual allocations (+ headroom)."""
    sub8 = lambda n: ((n + 7) // 8) * 8
    lane128 = lambda n: max(((n + 127) // 128) * 128, 128)
    w_bufs = n_wbuf * sub8(E) * class_tile * itemsize          # weight tiles
    out_bufs = 2 * sub8(B) * class_tile * 4                    # f32 logits tiles
    inv_bufs = 2 * 8 * class_tile * 4                          # (1, TC) norms
    x_bufs = 2 * sub8(B) * lane128(E) * itemsize               # x_n (reused)
    lbl_bufs = 2 * sub8(B) * 128 * 4                           # labels
    total = w_bufs + out_bufs + inv_bufs + x_bufs + lbl_bufs
    limit = int(total * 1.25) + (2 << 20)                      # 25% + fixed headroom
    limit = max(limit, 32 << 20)            # never below the v6e/v7x default
    limit = min(limit, phys - (8 << 20))    # stay safely below physical VMEM
    return limit


# ----------------------------------------------------------------------------
# Wrapper
# ----------------------------------------------------------------------------
def arcface_forward(x, weight, label, *, s=30.0, m=0.5,
                    class_tile=None, matmul_dtype=jnp.bfloat16):
    """x: (B, E) f32, weight: (C, E) f32, label: (B,) int -> (B, C) f32."""
    B, E = x.shape
    C, E2 = weight.shape
    assert E == E2

    cos_m = math.cos(m)
    sin_m = math.sin(m)
    th = math.cos(math.pi - m)
    mm = math.sin(math.pi - m) * m

    itemsize = jnp.dtype(matmul_dtype).itemsize
    phys_vmem = _physical_vmem_bytes()
    is_v7x = _looks_like_v7x()
    n_wbuf_tuned = 3 if is_v7x else 2

    if class_tile is None:
        # Size the streamed-weight pipeline buffers against a per-generation
        # budget (a quarter of physical VMEM, capped at 24 MiB), using the
        # *cast* dtype's itemsize.  Tile is a multiple of 128 (lane dim).
        weight_budget = min(24 << 20, phys_vmem // 4)
        bytes_per_class = max(E, 8) * itemsize
        cols = weight_budget // (n_wbuf_tuned * bytes_per_class)
        class_tile = max(128, min(8192, (cols // 128) * 128))
    # Never make the tile larger than the padded class count.
    class_tile = min(class_tile, pl.cdiv(C, 128) * 128)
    assert class_tile % 128 == 0 and class_tile >= 128

    # Pad C up to a multiple of the tile; padded (zero) weight columns produce
    # cosine == 0, are never selected by labels, and are sliced off at the end.
    C_pad = pl.cdiv(C, class_tile) * class_tile
    n_tiles = C_pad // class_tile

    # One fused pass over the f32 weight: per-class inverse norms (f32) plus
    # cast to the streaming dtype, transpose to (E, C) (lane-dense class axis)
    # and pad.  In production, store the weight already in this form.
    w32 = weight.astype(jnp.float32)
    w_sq = jnp.sum(w32 * w32, axis=-1)                          # (C,)
    inv_wn = lax.rsqrt(jnp.maximum(w_sq, 1e-24))                # == 1/max(||w||,1e-12)
    w_t = w32.astype(matmul_dtype).T                            # (E, C)
    if C_pad != C:
        w_t = jnp.pad(w_t, ((0, 0), (0, C_pad - C)))
        inv_wn = jnp.pad(inv_wn, (0, C_pad - C))                # zeros -> padded cos == 0
    inv_wn = inv_wn.reshape(1, C_pad).astype(jnp.float32)

    # Hoist the input normalization out of the class-tile loop (done once).
    x32 = x.astype(jnp.float32)
    x_sq = jnp.sum(x32 * x32, axis=-1, keepdims=True)
    x_n = (x32 * lax.rsqrt(jnp.maximum(x_sq, 1e-24))).astype(matmul_dtype)

    label2d = label.astype(jnp.int32).reshape(B, 1)

    kernel = functools.partial(
        _arcface_kernel, s=s, cos_m=cos_m, sin_m=sin_m, th=th, mm=mm)

    cost = pl.CostEstimate(
        flops=2 * B * C_pad * E,
        transcendentals=B * C_pad,                              # sqrt per logit
        bytes_accessed=(C_pad * E * itemsize                    # weight stream
                        + B * C_pad * 4                         # logits out
                        + B * E * itemsize + C_pad * 4 + B * 4),
    )

    def build_call(dim_sem, n_wbuf):
        w_kwargs = {}
        if n_wbuf != 2:
            w_kwargs["pipeline_mode"] = pl.Buffered(n_wbuf)
        grid_spec = pltpu.PrefetchScalarGridSpec(
            num_scalar_prefetch=0,
            grid=(n_tiles,),
            in_specs=[
                pl.BlockSpec((B, E), lambda j: (0, 0)),                      # x_n (full)
                pl.BlockSpec((E, class_tile), lambda j: (0, j), **w_kwargs), # weight tile
                pl.BlockSpec((1, class_tile), lambda j: (0, j)),             # inv ||w||
                pl.BlockSpec((B, 1), lambda j: (0, 0)),                      # labels (full)
            ],
            out_specs=pl.BlockSpec((B, class_tile), lambda j: (0, j)),
        )
        return pl.pallas_call(
            kernel,
            out_shape=jax.ShapeDtypeStruct((B, C_pad), jnp.float32),
            grid_spec=grid_spec,
            compiler_params=pltpu.CompilerParams(
                dimension_semantics=dim_sem,
                vmem_limit_bytes=_vmem_limit_bytes(
                    phys_vmem, n_wbuf, class_tile, E, B, itemsize),
            ),
            cost_estimate=cost,
        )

    # Config preference: on v7x, shard class tiles across the two TensorCores
    # and run a 3-deep weight pipeline; otherwise the portable config.
    configs = []
    if is_v7x and n_tiles > 1:
        configs.append(((pltpu.CORE_PARALLEL,), 3))
    configs.append(((pltpu.PARALLEL,), 2))

    if len(configs) == 1:
        out = build_call(*configs[0])(x_n, w_t, inv_wn, label2d)
    else:
        out, err = None, None
        for cfg in configs:
            try:
                out = jax.block_until_ready(
                    build_call(*cfg)(x_n, w_t, inv_wn, label2d))
                break
            except Exception as e:      # fall back to the portable config
                err, out = e, None
        if out is None:
            raise err

    if C_pad != C:
        out = out[:, :C]
    return out


# ----------------------------------------------------------------------------
# Pure-JAX reference (matches the PyTorch forward exactly)
# ----------------------------------------------------------------------------
def arcface_reference(x, weight, label, *, s=30.0, m=0.5):
    cos_m, sin_m = math.cos(m), math.sin(m)
    th = math.cos(math.pi - m)
    mm = math.sin(math.pi - m) * m
    xn = x / jnp.maximum(jnp.linalg.norm(x, axis=-1, keepdims=True), 1e-12)
    wn = weight / jnp.maximum(jnp.linalg.norm(weight, axis=-1, keepdims=True), 1e-12)
    cosine = xn @ wn.T
    sine = jnp.sqrt(jnp.clip(1.0 - cosine**2, 0.0, 1.0))
    phi = cosine * cos_m - sine * sin_m
    phi = jnp.where(cosine > th, phi, cosine - mm)
    out = cosine
    b = jnp.arange(x.shape[0])
    out = out.at[b, label].set(phi[b, label])
    return out * s


if __name__ == "__main__":
    B = 8      # batch
    E = 32     # embedding_size
    C = 300    # class_num (NOT a multiple of 128 -> exercises padding)

    key = jax.random.PRNGKey(0)
    kx, kw, kl = jax.random.split(key, 3)

    x = jax.random.normal(kx, (B, E), dtype=jnp.float32)

    # Deterministic Xavier-uniform init for weight (class_num, embedding_size)
    bound = math.sqrt(6.0 / (C + E))
    weight = jax.random.uniform(kw, (C, E), dtype=jnp.float32,
                                minval=-bound, maxval=bound)

    label = jax.random.randint(kl, (B,), 0, C, dtype=jnp.int32)

    ref = arcface_reference(x, weight, label)

    # 1) Full-precision MXU path with a small explicit tile (grid = 3): tight
    #    check of the spec semantics and of multi-tile / padding / scatter.
    out_f32 = arcface_forward(x, weight, label,
                              class_tile=128, matmul_dtype=jnp.float32)
    out_f32 = jax.block_until_ready(out_f32)
    assert out_f32.shape == (B, C)
    assert jnp.allclose(out_f32, ref, atol=5e-4, rtol=5e-4), "f32 mismatch vs reference"

    # 2) Production default: auto-sized tile, bf16 weight streaming (f32
    #    accumulation).  bf16 rounding of x and w gives logit errors up to
    #    ~0.3 at s=30 -> loose tolerance (documented precision trade-off).
    out_bf16 = jax.block_until_ready(arcface_forward(x, weight, label))
    assert out_bf16.shape == (B, C)
    assert jnp.allclose(out_bf16, ref, atol=0.5, rtol=2e-2), "bf16 mismatch vs reference"

    print("KERNEL_OK")
</pallas_src>

<mosaic_0001>
module attributes {stable_mosaic.version = 11 : i64} {
  func.func @_arcface_kernel(%arg0: i32, %arg1: memref<8x32xf32, #tpu.memory_space<vmem>>, %arg2: memref<32x128xf32, #tpu.memory_space<vmem>>, %arg3: memref<1x128xf32, #tpu.memory_space<vmem>>, %arg4: memref<8x1xi32, #tpu.memory_space<vmem>>, %arg5: memref<8x128xf32, #tpu.memory_space<vmem>>) attributes {dimension_semantics = [#tpu.dimension_semantics<parallel>], iteration_bounds = array<i64: 3>, scalar_prefetch = 0 : i64, scratch_operands = 0 : i64, tpu.core_type = #tpu.core_type<tc>, window_params = [{pipeline_mode = #tpu.pipeline_mode<synchronous>, transform_indices = @transform_0, window_bounds = array<i64: 8, 32>}, {transform_indices = @transform_1, window_bounds = array<i64: 32, 128>}, {transform_indices = @transform_2, window_bounds = array<i64: 1, 128>}, {pipeline_mode = #tpu.pipeline_mode<synchronous>, transform_indices = @transform_3, window_bounds = array<i64: 8, 1>}, {transform_indices = @transform_4, window_bounds = array<i64: 8, 128>}]} {
    %c0 = arith.constant 0 : index
    %c0_0 = arith.constant 0 : index
    %0 = vector.load %arg1[%c0, %c0_0] : memref<8x32xf32, #tpu.memory_space<vmem>>, vector<8x32xf32>
    %c0_1 = arith.constant 0 : index
    %c0_2 = arith.constant 0 : index
    %1 = vector.load %arg2[%c0_1, %c0_2] : memref<32x128xf32, #tpu.memory_space<vmem>>, vector<32x128xf32>
    %cst = arith.constant dense<0.000000e+00> : vector<8x128xf32>
    %2 = tpu.matmul %0, %1, %cst {dimension_numbers = #tpu.dot_dimension_numbers<[1], [0], [0], [1], [0, 0, 1, 1], [], []>} : vector<8x32xf32>, vector<32x128xf32>, vector<8x128xf32> -> vector<8x128xf32>
    %c0_3 = arith.constant 0 : index
    %c0_4 = arith.constant 0 : index
    %3 = vector.load %arg3[%c0_3, %c0_4] : memref<1x128xf32, #tpu.memory_space<vmem>>, vector<1x128xf32>
    %4 = vector.broadcast %3 : vector<1x128xf32> to vector<8x128xf32>
    %5 = arith.mulf %2, %4 : vector<8x128xf32>
    %6 = arith.mulf %5, %5 : vector<8x128xf32>
    %cst_5 = arith.constant 1.000000e+00 : f32
    %7 = vector.broadcast %cst_5 : f32 to vector<8x128xf32>
    %8 = arith.subf %7, %6 : vector<8x128xf32>
    %cst_6 = arith.constant 0.000000e+00 : f32
    %cst_7 = arith.constant 1.000000e+00 : f32
    %9 = vector.broadcast %cst_6 : f32 to vector<8x128xf32>
    %10 = arith.maximumf %9, %8 : vector<8x128xf32>
    %11 = vector.broadcast %cst_7 : f32 to vector<8x128xf32>
    %12 = arith.minimumf %11, %10 : vector<8x128xf32>
    %13 = math.sqrt %12 : vector<8x128xf32>
    %cst_8 = arith.constant 0.87758255 : f32
    %14 = vector.broadcast %cst_8 : f32 to vector<8x128xf32>
    %15 = arith.mulf %5, %14 : vector<8x128xf32>
    %cst_9 = arith.constant 0.47942555 : f32
    %16 = vector.broadcast %cst_9 : f32 to vector<8x128xf32>
    %17 = arith.mulf %13, %16 : vector<8x128xf32>
    %18 = arith.subf %15, %17 : vector<8x128xf32>
    %cst_10 = arith.constant -0.87758255 : f32
    %19 = vector.broadcast %cst_10 : f32 to vector<8x128xf32>
    %20 = arith.cmpf ogt, %5, %19 : vector<8x128xf32>
    %cst_11 = arith.constant 0.239712775 : f32
    %21 = vector.broadcast %cst_11 : f32 to vector<8x128xf32>
    %22 = arith.subf %5, %21 : vector<8x128xf32>
    %23 = arith.select %20, %18, %22 : vector<8x128xi1>, vector<8x128xf32>
    %c128_i32 = arith.constant 128 : i32
    %24 = arith.muli %arg0, %c128_i32 : i32
    %25 = tpu.iota {dimensions = array<i32: 1>} : vector<8x128xi32>
    %26 = vector.broadcast %24 : i32 to vector<8x128xi32>
    %27 = arith.addi %26, %25 : vector<8x128xi32>
    %c0_12 = arith.constant 0 : index
    %c0_13 = arith.constant 0 : index
    %28 = vector.load %arg4[%c0_12, %c0_13] : memref<8x1xi32, #tpu.memory_space<vmem>>, vector<8x1xi32>
    %29 = vector.broadcast %28 : vector<8x1xi32> to vector<8x128xi32>
    %30 = arith.cmpi eq, %27, %29 : vector<8x128xi32>
    %31 = arith.select %30, %23, %5 : vector<8x128xi1>, vector<8x128xf32>
    %cst_14 = arith.constant 3.000000e+01 : f32
    %32 = vector.broadcast %cst_14 : f32 to vector<8x128xf32>
    %33 = arith.mulf %31, %32 : vector<8x128xf32>
    %c0_15 = arith.constant 0 : index
    %c0_16 = arith.constant 0 : index
    %34 = vector.load %arg5[%c0_15, %c0_16] : memref<8x128xf32, #tpu.memory_space<vmem>>, vector<8x128xf32>
    tpu.vector_store %arg5[%c0_15, %c0_16], %33 {strides = array<i32>} : memref<8x128xf32, #tpu.memory_space<vmem>>, vector<8x128xf32>,
    return
  }
  func.func @transform_0(%arg0: i32) -> (i32, i32) {
    %c0_i32 = arith.constant 0 : i32
    %c0_i32_0 = arith.constant 0 : i32
    %c0_i32_1 = arith.constant 0 : i32
    return %c0_i32, %c0_i32_0 : i32, i32
  }
  func.func @transform_1(%arg0: i32) -> (i32, i32) {
    %c0_i32 = arith.constant 0 : i32
    %c0_i32_0 = arith.constant 0 : i32
    return %c0_i32, %arg0 : i32, i32
  }
  func.func @transform_2(%arg0: i32) -> (i32, i32) {
    %c0_i32 = arith.constant 0 : i32
    %c0_i32_0 = arith.constant 0 : i32
    return %c0_i32, %arg0 : i32, i32
  }
  func.func @transform_3(%arg0: i32) -> (i32, i32) {
    %c0_i32 = arith.constant 0 : i32
    %c0_i32_0 = arith.constant 0 : i32
    %c0_i32_1 = arith.constant 0 : i32
    return %c0_i32, %c0_i32_0 : i32, i32
  }
  func.func @transform_4(%arg0: i32) -> (i32, i32) {
    %c0_i32 = arith.constant 0 : i32
    %c0_i32_0 = arith.constant 0 : i32
    return %c0_i32, %arg0 : i32, i32
  }
}

</mosaic_0001>

<bundles_post_ra>
// kernel: tpu_custom_call.1
= control target key start
LH: loop header
LB: loop body
LE: loop exit
PB: predicated region body
PF: predicated region fallthrough
CT: control target
= control target key end

     0   :  { %9 = vsyncpa [#allocation3], 0  ;;  %s837_s0 = inlined_call_operand.vmem [shape: f32[8,32], index: 0, kind: input, shape index: {}]   ;;  %s838_s1 = inlined_call_operand.hbm [shape: f32[32,384], index: 1, kind: input, shape index: {}]   ;;  %s839_s2 = inlined_call_operand.vmem [shape: f32[1,384], index: 2, kind: input, shape index: {}]   ;;  %s840_s3 = inlined_call_operand.vmem [shape: s32[8,1], index: 3, kind: input, shape index: {}]   ;;  %s841_s4 = inlined_call_operand.hbm [shape: f32[8,384], index: 4, kind: output, shape index: {}]  }
   0x1   :  { %11 = vsyncpa [#allocation3 + $0x1], 0 }
   0x2   :  { %12 = vsyncpa [#allocation4], 0 }
   0x3   :  { %14 = vsyncpa [#allocation4 + $0x1], 0  ;;  %s665_s15 = smov 0   ;;  %s667_s16 = smov 0  }
   0x4   :  { %s669_s17 = smov 0   ;;  %s671_s18 = smov 0  }
   0x5 LB: > { %s686_s19 = sadd.s32 4294967295, %s629_s18   ;;  %s439_s20 = sadd.s32 4294967294, %s629_s18   ;;  %s629_s18 = sphi %s671_s18, %s854_s18   ;;  %s625_s17 = sphi %s669_s17, %s853_s17   ;;  %s621_s16 = sphi %s667_s16, %s852_s16   ;;  %s617_s15 = sphi %s665_s15, %s851_s15  }
   0x6   : > { %s690_s21 = sadd.s32 1, %s629_s18   ;;  %s48_s22 = sadd.s32 1, %s625_s17 }
   0x7   : > { %s45_s23 = ssub.s32 %s629_s18, %s690_s21  ;;  %p55_p0 = scmp.ne.s32.totalorder %s625_s17, %s621_s16 }
   0x8   : > { %p46_p1 = scmp.eq.s32.totalorder %s45_s23, 0  ;;  %p56_p2 = scmp.eq.s32.totalorder %s629_s18, 0 }
   0x9   : > { %p61_p3 = scmp.ne.s32.totalorder %s621_s16, %s617_s15  ;;  %p62_p4 = scmp.eq.s32.totalorder %s686_s19, 0 }
   0xa   : > { %s702_s24 = scalar_select %p46_p1, %s625_s17, %s48_s22  }
   0xb   : > { %p704_p5 = por %p56_p2, %p55_p0  ;;  %p708_p6 = por %p62_p4, %p61_p3 }
   0xc   : > { %p132_p7 = scmp.eq.s32.totalorder %s686_s19, 2  ;;  %p138_p8 = scmp.eq.s32.totalorder %s439_s20, 2 }
   0xd   : > { %p489_p9 = scmp.lt.s32.totalorder %s629_s18, 3  ;;  %s164_s29 = sand.u32 1, %s625_s17  }
   0xe   : > { %p714_p10 = por %p132_p7, %p55_p0  ;;  %p718_p11 = por %p138_p8, %p61_p3 }
   0xf   : > { %s443_s30 = sshll.u32 %s629_s18, 7  ;;  %s442_s5 = sshll.u32 %s164_s29, 5 }
  0x10   : > { %s845_s27 = scalar_select %p714_p10, 1, 0 }
  0x11   : > { %s846_s28 = scalar_select %p718_p11, 1, 0 }
  0x12   : > { %s727_s8 = scalar_lea.hbm %s838_s1, %s443_s30  ;;  %s168_s9 = scalar_lea.vmem [#allocation2], %s442_s5 }
  0x13   : > { %s174_s10 = sshll.u32 %s168_s9, 4  ;;  %p731_p12 = pnand %p489_p9, %p704_p5  ;;  %s735_s10 = int_to_ptr.vmem [resolvable:$true] %s174_s10 }
  0x14   : > { %s738_s12 = scalar_lea.sflag [#allocation3], %s164_s29  ;;  %s533_s13 = scalar_lea.hbm %s727_s8, 512 }
  0x15   : > { %p534_p0 = scmp.ne.s32.totalorder %s727_s8, %s533_s13  ;;  %p535_p1 = pneg %p731_p12 }
  0x16   : > { %s538_s22 = scalar_lea.hbm %s838_s1, 1536  ;;  %p539_p4 = scmp.lt.u32.totalorder %s727_s8, %s838_s1 }
  0x17   : > { %p536_p2 = pnand %p535_p1, %p534_p0  ;;  %p540_p5 = scmp.lt.u32.totalorder %s538_s22, %s533_s13 }
  0x18   : > { %p542_p8 = scmp.lt.u32.totalorder %s533_s13, %s727_s8 }
  0x19   : > { %p537_p3 = pneg %p536_p2  ;;  %p541_p7 = por %p540_p5, %p539_p4 }
  0x1b   : > { %p543_p9 = por %p542_p8, %p541_p7 }
  0x1d   : > { %p544_p13 = pnand %p543_p9, %p537_p3 }
  0x1f   : > { %547 = shalt.err (!%p544_p13)
}
  0x20   : > { %s548_s29 = scalar_lea.vmem %s735_s10, 512  ;;  %s631_s30 = smov [#allocation2]  }
  0x21   : > { %p549_p0 = scmp.ne.s32.totalorder %s735_s10, %s548_s29  ;;  %s553_s5 = sshll.u32 %s631_s30, 4  ;;  %s554_s5 = int_to_ptr.vmem [resolvable:$false] %s553_s5 }
  0x22   : > { %s555_s6 = scalar_lea.vmem %s554_s5, 1024  ;;  %p556_p10 = scmp.lt.s32.totalorder %s735_s10, %s554_s5 }
  0x23   : > { %p551_p2 = pnand %p549_p0, %p535_p1  ;;  %p557_p4 = scmp.lt.s32.totalorder %s555_s6, %s548_s29 }
  0x25   : > { %p552_p11 = pneg %p551_p2  ;;  %p558_p5 = por %p557_p4, %p556_p10 }
  0x27   : > { %p559_p7 = pnand %p558_p5, %p552_p11 }
  0x29   : > { %562 = shalt.err (!%p559_p7)
}
  0x2a   : > { %s632_s7 = smov 384   ;;  %s633_s9 = smov 128  }
  0x2b   : > { %s634_s13 = smov 8   ;;  %p188_p13 = scmp.lt.s32.totalorder %s629_s18, 4 }
  0x2c   : > { %484 = dma.hbm_to_vmem [thread:$0]  (!%p731_p12), %s727_s8, 512, %s735_s10, %s738_s12, %s632_s7, %s633_s9, %s634_s13  }
  0x2d   : > { %p848_p1 = scmp.ge.s32.totalorder %s629_s18, 1 }
  0x2f   : > { %p189_p3 = pnand %p848_p1, %p188_p13 }
  0x30   : > { %s770_s14 = sand.u32 (!%p189_p3), 1, %s621_s16  }
  0x31   : > { %192 = sbr.rel (%p189_p3) target bundleno = 327 (0x147), region = 36  ;;  %s445_s20 = sshll.u32 (!%p189_p3), %s770_s14, 5 }
  0x32   : > { %s195_s22 = scalar_lea.sflag (!%p189_p3), [#allocation3], %s770_s14  ;;  %s198_s23 = scalar_lea.vmem (!%p189_p3), [#allocation2], %s445_s20 }
  0x38   : > { %608 = dma.done.wait (%p708_p6), %s195_s22, 512  }
  0x39   : > { %610 = vsyncadd (%p708_p6), %s195_s22, 4294966784  ;;  %v635_v0 = vmov 0.0|0.0   ;;  %vm636_vm0 = vmmov 0   ;;  %v637_v1 = vmov 0.0   ;;  %v638_v2 = vmov 0   ;;  %v230_v3 = vld [vmem:[%s198_s23] sm:$0xff] }
  0x3a   : > { %471 = vmatprep.subr.bf16.mxu0 %v635_v0  ;;  %468 = vmatprep.mubr.msk.f32.mxu0 %vm636_vm0, %v637_v1  ;;  %v231_v4 = vld [vmem:[%s198_s23 + $0x8] sm:$0xff]  ;;  %v232_v5 = vld [vmem:[%s198_s23 + $0x10] sm:$0xff]  ;;  %v233_v7 = vld [vmem:[%s198_s23 + $0x18] sm:$0xff]  ;;  %vm234_vm1 = vcmask 261120   ;;  %p226_p6 = scmp.lt.s32.totalorder %s686_s19, 2  ;;  %v334_v19 = vlaneseq  ;;  %s450_s5 = sshll.u32 %s686_s19, 7 }
  0x3b   : > { %530 = vset.pattern.permute.xlu0 %v638_v2  ;;  %v472_v6 = vpack.c.bf16 %v231_v4, %v230_v3  ;;  %v338_v8 = vld [vmem:[%s840_s3] sm:$0xff]  ;;  %v475_v9 = vpack.c.bf16 %v233_v7, %v232_v5  ;;  %v336_v22 = vstv %s450_s5  ;;  %s446_s6 = sshll.u32 %s770_s14, 3  ;;  %s794_s20 = scalar_lea.hbm %s841_s4, %s450_s5 }
  0x3c   : > { %340 = vperm.xlu0 %530, %v338_v8   ;;  %v229_v10 = vld [vmem:[%s837_s0] sm:$0xff]  ;;  %s227_s12 = scalar_select %p226_p6, %s686_s19, 2  ;;  %v335_v20 = vand.u32 127, %v334_v19 }
  0x3d   : > { %473 = vmatpush3.bf16.msra.mxu0 %v472_v6  ;;  %s225_s19 = scalar_lea.vmem [#allocation5], %s446_s6  ;;  %s347_s22 = scalar_lea.sflag [#allocation4], %s770_s14 }
  0x3e   : > { %474 = vmatprep.subr.bf16.mxu0 %v635_v0  ;;  %s228_s30 = scalar_lea.vmem %s839_s2, %s227_s12  ;;  %v337_v25 = vadd.s32 %v336_v22, %v335_v20  ;;  %s360_s7 = sshll.u32 %s225_s19, 4  ;;  %s796_s7 = int_to_ptr.vmem [resolvable:$true] %s360_s7 }
  0x3f   : > { %v448_v11 = vld [vmem:[%s228_s30] ss:$0 sm:$0xff]  ;;  %s563_s23 = scalar_lea.vmem %s796_s7, 128  ;;  %p849_p11 = scmp.ne.s32.totalorder %s845_s27, 0 }
  0x40   : > { %p564_p10 = scmp.ne.s32.totalorder %s796_s7, %s563_s23  ;;  %s639_s8 = smov [#allocation5]  }
  0x41   : > { %476 = vmatpush3.bf16.msra.mxu0 %v475_v9  ;;  %s567_s10 = sshll.u32 %s639_s8, 4  ;;  %s568_s10 = int_to_ptr.vmem [resolvable:$false] %s567_s10 }
  0x42   : > { %p565_p12 = pnand %p564_p10, %p849_p11  ;;  %s569_s26 = scalar_lea.vmem %s568_s10, 256 }
  0x43   : > { %p570_p9 = scmp.lt.s32.totalorder %s796_s7, %s568_s10  ;;  %p571_p0 = scmp.lt.s32.totalorder %s569_s26, %s563_s23 }
  0x44   : > { %469 = vmatmul.mubr.msk.f32.vlgmr.msra.gmra.mrb[0].mxu0 %vm234_vm1, %v229_v10  ;;  %p566_p8 = pneg %p565_p12 }
  0x45   : > { %p572_p2 = por %p571_p0, %p570_p9 }
  0x47   : > { %p573_p4 = pnand %p572_p2, %p566_p8 }
  0xbb   : > { %v341_v27 = vpop.permute.xlu0 %340 }
  0xbc   : > { %vm342_vm4 = vcmp.eq.s32.totalorder %v337_v25, %v341_v27 }
 0x117   : > { %v304_v12 = vpop.f32.mrb[0].mxu0 }
 0x118   : > { %v315_v13 = vmul.f32 %v448_v11, %v304_v12  ;;  %v470_v14 = vpop.f32.mrb[1].mxu0 }
 0x11a   : > { %v316_v15 = vmul.f32 %v315_v13, %v315_v13  ;;  %v327_v29 = vmul.f32 0.87758255, %v315_v13  ;;  %v449_v32 = vadd.f32 -0.23971277, %v315_v13  ;;  %vm330_vm5 = vcmp.gt.f32.partialorder %v315_v13, -0.87758255 }
 0x11c   : > { %v317_v16 = vsub.f32 1.0, %v316_v15 }
 0x11e   : > { %v318_v17 = vmax.f32 %v317_v16, 0.0 }
 0x120   : > { %v319_v18 = vmin.f32 %v318_v17, 1.0 }
 0x122   : > { %531 = vrsqrt.f32 %v319_v18  ;;  %vm322_vm2 = vcmp.eq.f32.partialorder %v319_v18, inf  ;;  %v325_v24 = vand.u32 2147483648, %v319_v18  ;;  %vm324_vm3 = vcmp.eq.f32.partialorder %v319_v18, 0.0 }
 0x12c   : > { %v532_v21 = vpop.eup %531 }
 0x12d   : > { %v321_v23 = vmul.f32 %v532_v21, %v319_v18 }
 0x12f   : > { %v323_v26 = vsel %vm322_vm2, %v319_v18, %v321_v23 }
 0x130   : > { %v326_v28 = vsel %vm324_vm3, %v325_v24, %v323_v26 }
 0x131   : > { %v328_v30 = vmul.f32 0.47942555, %v326_v28 }
 0x133   : > { %v329_v31 = vsub.f32 %v327_v29, %v328_v30 }
 0x135   : > { %v332_v33 = vsel %vm330_vm5, %v329_v31, %v449_v32 }
 0x136   : > { %v343_v34 = vsel %vm342_vm4, %v332_v33, %v315_v13 }
 0x137   : > { %v344_v35 = vmul.f32 30.0, %v343_v34 }
 0x139   : > { %345 = vst [vmem:[%s225_s19] sm:$0xff] %v344_v35 }
 0x13a   : > { %576 = shalt.err (!%p573_p4)
}
 0x13b   : > { %s577_s14 = scalar_lea.hbm %s794_s20, 128  ;;  %s581_s25 = scalar_lea.hbm %s841_s4, 384 }
 0x13c   : > { %p578_p5 = scmp.ne.s32.totalorder %s794_s20, %s577_s14  ;;  %p582_p1 = scmp.lt.u32.totalorder %s794_s20, %s841_s4 }
 0x13d   : > { %p583_p3 = scmp.lt.u32.totalorder %s581_s25, %s577_s14  ;;  %p585_p10 = scmp.lt.u32.totalorder %s577_s14, %s794_s20 }
 0x13e   : > { %p579_p7 = pnand %p578_p5, %p849_p11 }
 0x13f   : > { %p584_p6 = por %p583_p3, %p582_p1 }
 0x140   : > { %p580_p13 = pneg %p579_p7 }
 0x141   : > { %p586_p12 = por %p585_p10, %p584_p6 }
 0x143   : > { %p587_p8 = pnand %p586_p12, %p580_p13 }
 0x145   : > { %590 = shalt.err (!%p587_p8)
}
 0x146   : > { %479 = dma.vmem_to_hbm [thread:$0]  (%p849_p11), %s796_s7, 128, %s794_s20, %s347_s22  }
 0x147 PF: > { %p490_p9 = scmp.ge.s32.totalorder %s629_s18, 2  ;;  %s372_s5 = sand.u32 1, %s617_s15  }
 0x148   : > { %p850_p0 = scmp.ne.s32.totalorder %s846_s28, 0  ;;  %s373_s6 = scalar_lea.sflag [#allocation4], %s372_s5 }
 0x14a   : > { %p486_p2 = pnand %p490_p9, %p850_p0 }
 0x14c   : > { %612 = dma.done.wait (!%p486_p2), %s373_s6, 128  }
 0x14d   : > { %614 = vsyncadd (!%p486_p2), %s373_s6, 4294967168  ;;  %p17_p4 = scmp.ge.s32.totalorder %s690_s21, 5   ;;  %s851_s15 = smov %s621_s16 }
 0x14e   : > { %s852_s16 = smov %s625_s17  ;;  %s853_s17 = smov %s702_s24 }
 0x14f   : > { %s854_s18 = smov %s690_s21  ;;  %19 = sbr.rel (!%p17_p4) target bundleno = 5 (0x5), region = 84 }
 0x156   :  { %378 = vsyncpa [#allocation3], 1 }
 0x157   :  { %380 = vsyncpa [#allocation3 + $0x1], 1 }
 0x158   :  { %381 = vsyncpa [#allocation4], 1 }
 0x159   :  { %383 = vsyncpa [#allocation4 + $0x1], 1 }

</bundles_post_ra>
